<compile_context>
chip_gen: v6e
topology: v6e:2x2x1
jax: 0.10.0
libtpu: 0.0.40
codegen_flags: <defaults>
</compile_context>

<pallas_src>
import jax
import jax.numpy as jnp
from jax.experimental import pallas as pl
from jax.experimental.pallas import tpu as pltpu


def _round_up(x: int, m: int) -> int:
    return ((x + m - 1) // m) * m


def decoder_kernel(z_ref, w1_ref, b1_ref, w2_ref, b2_ref, out_ref):
    # Hidden layer: bf16 MXU matmul with f32 accumulation, then f32 bias + ReLU.
    z = z_ref[...]                                              # (TB, D) f32
    h = jnp.dot(z.astype(jnp.bfloat16), w1_ref[...],            # w1 is bf16
                preferred_element_type=jnp.float32)             # (TB, Hp) f32 acc
    h = jnp.maximum(h + b1_ref[...], 0.0)                       # bias + ReLU on VPU (f32)
    # Output head: downcast activations to bf16 only as the MXU input,
    # never the accumulator (explicit mixed-precision contract).
    logits = jnp.dot(h.astype(jnp.bfloat16), w2_ref[...],       # w2 is bf16
                     preferred_element_type=jnp.float32)        # (TB, Op) f32 acc
    out_ref[...] = (logits + b2_ref[...]).astype(out_ref.dtype)


def decoder_forward(z, w1, b1, w2, b2, *, block_b: int = 256):
    """logits = ReLU(z @ w1 + b1) @ w2 + b2 as a batched Pallas TPU kernel.

    z: (B, D) f32;  w1: (D, H);  b1: (1, H);  w2: (H, O);  b2: (1, O).
    """
    B, D = z.shape
    H = w1.shape[1]
    O = w2.shape[1]

    # --- pad ragged dims to TPU-friendly sizes (zero padding is numerically inert) ---
    Hp = _round_up(H, 128)               # hidden lanes: e.g. 400 -> 512
    Op = _round_up(O, 128)               # output lanes (lane-dense stores)
    TB = min(block_b, _round_up(B, 8))   # rows per batch tile / MXU pass
    Bp = _round_up(B, TB)

    zp = jnp.pad(z, ((0, Bp - B), (0, 0)))
    # Weights cast to bf16 once (halves weight DMA); biases stay f32.
    w1p = jnp.pad(w1, ((0, 0), (0, Hp - H))).astype(jnp.bfloat16)
    b1p = jnp.pad(b1, ((0, 0), (0, Hp - H)))
    w2p = jnp.pad(w2, ((0, Hp - H), (0, Op - O))).astype(jnp.bfloat16)
    b2p = jnp.pad(b2, ((0, 0), (0, Op - O)))

    flops = 2 * Bp * (D * Hp + Hp * Op)
    bytes_accessed = (zp.size * 4 + w1p.size * 2 + b1p.size * 4
                      + w2p.size * 2 + b2p.size * 4 + Bp * Op * 4)

    out = pl.pallas_call(
        decoder_kernel,
        out_shape=jax.ShapeDtypeStruct((Bp, Op), z.dtype),
        grid=(Bp // TB,),
        in_specs=[
            pl.BlockSpec((TB, D), lambda i: (i, 0)),    # z: tiled over batch rows
            pl.BlockSpec((D, Hp), lambda i: (0, 0)),    # weights / biases: constant
            pl.BlockSpec((1, Hp), lambda i: (0, 0)),    #   index_map -> VMEM-resident
            pl.BlockSpec((Hp, Op), lambda i: (0, 0)),   #   across all batch tiles
            pl.BlockSpec((1, Op), lambda i: (0, 0)),
        ],
        out_specs=pl.BlockSpec((TB, Op), lambda i: (i, 0)),
        compiler_params=pltpu.CompilerParams(
            dimension_semantics=("parallel",)),         # shard batch tiles across cores
        cost_estimate=pl.CostEstimate(flops=flops, transcendentals=0,
                                      bytes_accessed=bytes_accessed),
    )(zp, w1p, b1p, w2p, b2p)

    return out[:B, :O]


def init_decoder_params(key, latent_dim, output_dim, hidden_dim):
    """Deterministic init mirroring nn.Linear's uniform(-1/sqrt(fan_in), ...)."""
    k1, k2, k3, k4 = jax.random.split(key, 4)
    lim1 = 1.0 / jnp.sqrt(latent_dim)
    lim2 = 1.0 / jnp.sqrt(hidden_dim)
    w1 = jax.random.uniform(k1, (latent_dim, hidden_dim), jnp.float32, -lim1, lim1)
    b1 = jax.random.uniform(k2, (1, hidden_dim), jnp.float32, -lim1, lim1)
    w2 = jax.random.uniform(k3, (hidden_dim, output_dim), jnp.float32, -lim2, lim2)
    b2 = jax.random.uniform(k4, (1, output_dim), jnp.float32, -lim2, lim2)
    return w1, b1, w2, b2


if __name__ == "__main__":
    # Small shapes consistent with the module: batch=8, latent=32,
    # hidden_dims=(400,) (PyTorch default), output_dim=256.
    B, LATENT, HIDDEN, OUT = 8, 32, 400, 256

    key = jax.random.PRNGKey(0)
    kz, kp = jax.random.split(key)
    z = jax.random.normal(kz, (B, LATENT), jnp.float32)
    w1, b1, w2, b2 = init_decoder_params(kp, LATENT, OUT, HIDDEN)

    logits = decoder_forward(z, w1, b1, w2, b2)
    jax.block_until_ready(logits)
    assert logits.shape == (B, OUT)

    # Reference with the SAME mixed-precision contract (bf16 MXU inputs,
    # f32 accumulation) -- tight tolerance.
    w1b, w2b = w1.astype(jnp.bfloat16), w2.astype(jnp.bfloat16)
    h_ref = jnp.maximum(
        jnp.dot(z.astype(jnp.bfloat16), w1b, preferred_element_type=jnp.float32) + b1, 0.0)
    ref_bf16 = jnp.dot(h_ref.astype(jnp.bfloat16), w2b,
                       preferred_element_type=jnp.float32) + b2
    assert jnp.allclose(logits, ref_bf16, atol=2e-3, rtol=2e-3)

    # Loose sanity check against the full-f32 module semantics.
    ref_f32 = jnp.maximum(z @ w1 + b1, 0.0) @ w2 + b2
    assert jnp.allclose(logits, ref_f32, atol=5e-2, rtol=5e-2)

    print("KERNEL_OK")
</pallas_src>

<mosaic_0001>
module attributes {stable_mosaic.version = 11 : i64} {
  func.func @decoder_kernel(%arg0: i32, %arg1: memref<8x32xf32, #tpu.memory_space<vmem>>, %arg2: memref<32x512xbf16, #tpu.memory_space<vmem>>, %arg3: memref<1x512xf32, #tpu.memory_space<vmem>>, %arg4: memref<512x256xbf16, #tpu.memory_space<vmem>>, %arg5: memref<1x256xf32, #tpu.memory_space<vmem>>, %arg6: memref<8x256xf32, #tpu.memory_space<vmem>>) attributes {dimension_semantics = [#tpu.dimension_semantics<parallel>], iteration_bounds = array<i64: 1>, scalar_prefetch = 0 : i64, scratch_operands = 0 : i64, tpu.core_type = #tpu.core_type<tc>, window_params = [{transform_indices = @transform_0, window_bounds = array<i64: 8, 32>}, {pipeline_mode = #tpu.pipeline_mode<synchronous>, transform_indices = @transform_1, window_bounds = array<i64: 32, 512>}, {pipeline_mode = #tpu.pipeline_mode<synchronous>, transform_indices = @transform_2, window_bounds = array<i64: 1, 512>}, {pipeline_mode = #tpu.pipeline_mode<synchronous>, transform_indices = @transform_3, window_bounds = array<i64: 512, 256>}, {pipeline_mode = #tpu.pipeline_mode<synchronous>, transform_indices = @transform_4, window_bounds = array<i64: 1, 256>}, {transform_indices = @transform_5, window_bounds = array<i64: 8, 256>}]} {
    %c0 = arith.constant 0 : index
    %c0_0 = arith.constant 0 : index
    %0 = vector.load %arg1[%c0, %c0_0] : memref<8x32xf32, #tpu.memory_space<vmem>>, vector<8x32xf32>
    %1 = arith.truncf %0 : vector<8x32xf32> to vector<8x32xbf16>
    %c0_1 = arith.constant 0 : index
    %c0_2 = arith.constant 0 : index
    %2 = vector.load %arg2[%c0_1, %c0_2] : memref<32x512xbf16, #tpu.memory_space<vmem>>, vector<32x512xbf16>
    %cst = arith.constant dense<0.000000e+00> : vector<8x512xf32>
    %3 = tpu.matmul %1, %2, %cst {dimension_numbers = #tpu.dot_dimension_numbers<[1], [0], [0], [1], [0, 0, 1, 1], [], []>} : vector<8x32xbf16>, vector<32x512xbf16>, vector<8x512xf32> -> vector<8x512xf32>
    %c0_3 = arith.constant 0 : index
    %c0_4 = arith.constant 0 : index
    %4 = vector.load %arg3[%c0_3, %c0_4] : memref<1x512xf32, #tpu.memory_space<vmem>>, vector<1x512xf32>
    %5 = vector.broadcast %4 : vector<1x512xf32> to vector<8x512xf32>
    %6 = arith.addf %3, %5 : vector<8x512xf32>
    %cst_5 = arith.constant 0.000000e+00 : f32
    %7 = vector.broadcast %cst_5 : f32 to vector<8x512xf32>
    %8 = arith.maximumf %6, %7 : vector<8x512xf32>
    %9 = arith.truncf %8 : vector<8x512xf32> to vector<8x512xbf16>
    %c0_6 = arith.constant 0 : index
    %c0_7 = arith.constant 0 : index
    %10 = vector.load %arg4[%c0_6, %c0_7] : memref<512x256xbf16, #tpu.memory_space<vmem>>, vector<512x256xbf16>
    %cst_8 = arith.constant dense<0.000000e+00> : vector<8x256xf32>
    %11 = tpu.matmul %9, %10, %cst_8 {dimension_numbers = #tpu.dot_dimension_numbers<[1], [0], [0], [1], [0, 0, 1, 1], [], []>} : vector<8x512xbf16>, vector<512x256xbf16>, vector<8x256xf32> -> vector<8x256xf32>
    %c0_9 = arith.constant 0 : index
    %c0_10 = arith.constant 0 : index
    %12 = vector.load %arg5[%c0_9, %c0_10] : memref<1x256xf32, #tpu.memory_space<vmem>>, vector<1x256xf32>
    %13 = vector.broadcast %12 : vector<1x256xf32> to vector<8x256xf32>
    %14 = arith.addf %11, %13 : vector<8x256xf32>
    %c0_11 = arith.constant 0 : index
    %c0_12 = arith.constant 0 : index
    %15 = vector.load %arg6[%c0_11, %c0_12] : memref<8x256xf32, #tpu.memory_space<vmem>>, vector<8x256xf32>
    tpu.vector_store %arg6[%c0_11, %c0_12], %14 {strides = array<i32>} : memref<8x256xf32, #tpu.memory_space<vmem>>, vector<8x256xf32>,
    return
  }
  func.func @transform_0(%arg0: i32) -> (i32, i32) {
    %c0_i32 = arith.constant 0 : i32
    %c0_i32_0 = arith.constant 0 : i32
    return %arg0, %c0_i32 : i32, i32
  }
  func.func @transform_1(%arg0: i32) -> (i32, i32) {
    %c0_i32 = arith.constant 0 : i32
    %c0_i32_0 = arith.constant 0 : i32
    %c0_i32_1 = arith.constant 0 : i32
    return %c0_i32, %c0_i32_0 : i32, i32
  }
  func.func @transform_2(%arg0: i32) -> (i32, i32) {
    %c0_i32 = arith.constant 0 : i32
    %c0_i32_0 = arith.constant 0 : i32
    %c0_i32_1 = arith.constant 0 : i32
    return %c0_i32, %c0_i32_0 : i32, i32
  }
  func.func @transform_3(%arg0: i32) -> (i32, i32) {
    %c0_i32 = arith.constant 0 : i32
    %c0_i32_0 = arith.constant 0 : i32
    %c0_i32_1 = arith.constant 0 : i32
    return %c0_i32, %c0_i32_0 : i32, i32
  }
  func.func @transform_4(%arg0: i32) -> (i32, i32) {
    %c0_i32 = arith.constant 0 : i32
    %c0_i32_0 = arith.constant 0 : i32
    %c0_i32_1 = arith.constant 0 : i32
    return %c0_i32, %c0_i32_0 : i32, i32
  }
  func.func @transform_5(%arg0: i32) -> (i32, i32) {
    %c0_i32 = arith.constant 0 : i32
    %c0_i32_0 = arith.constant 0 : i32
    return %arg0, %c0_i32 : i32, i32
  }
}

</mosaic_0001>

<bundles_post_ra>
// kernel: tpu_custom_call.1
= control target key start
LH: loop header
LB: loop body
LE: loop exit
PB: predicated region body
PF: predicated region fallthrough
CT: control target
= control target key end

     0   :  { %10 = vsyncpa [#allocation3], 0  ;;  %s1094_s0 = inlined_call_operand.hbm [shape: f32[8,32], index: 0, kind: input, shape index: {}]   ;;  %s1095_s1 = inlined_call_operand.hbm [shape: bf16[32,512], index: 1, kind: input, shape index: {}]   ;;  %s1096_s2 = inlined_call_operand.hbm [shape: f32[1,512], index: 2, kind: input, shape index: {}]   ;;  %s1097_s3 = inlined_call_operand.hbm [shape: bf16[512,256], index: 3, kind: input, shape index: {}]   ;;  %s1098_s4 = inlined_call_operand.vmem [shape: f32[1,256], index: 4, kind: input, shape index: {}]   ;;  %s1099_s5 = inlined_call_operand.hbm [shape: f32[8,256], index: 5, kind: output, shape index: {}]  }
   0x1   :  { %11 = vsyncpa [#allocation6], 0 }
   0x2   :  { %12 = vsyncpa [#allocation9], 0 }
   0x3   :  { %13 = vsyncpa [#allocation4], 0  ;;  %s1036_s18 = smov [#allocation5]  }
   0x4   :  { %s29_s19 = sshll.u32 %s1036_s18, 4  ;;  %s30_s19 = int_to_ptr.vmem [resolvable:$true] %s29_s19 }
   0x5   :  { %s936_s20 = scalar_lea.vmem %s30_s19, 1024  ;;  %p941_p1 = scmp.lt.s32.totalorder %s30_s19, %s30_s19 }
   0x6   :  { %p937_p0 = scmp.ne.s32.totalorder %s30_s19, %s936_s20  ;;  %p942_p2 = scmp.lt.s32.totalorder %s936_s20, %s936_s20 }
   0x8   :  { %p943_p3 = por %p942_p2, %p941_p1 }
   0xa   :  { %p944_p4 = pnand %p943_p3, %p937_p0 }
   0xc   :  { %947 = shalt.err (!%p944_p4)
}
   0xd   :  { %s1037_s21 = smov 256   ;;  %s1038_s22 = smov 16  }
   0xe   :  { %35 = dma.hbm_to_vmem [thread:$0]  %s1095_s1, 1024, %s30_s19, [#allocation6], %s1037_s21, %s1037_s21, %s1038_s22  }
   0xf   :  { %s1039_s25 = smov [#allocation2]   ;;  %s1040_s27 = smov [#allocation7]  }
  0x10   :  { %s20_s26 = sshll.u32 %s1039_s25, 4  ;;  %s42_s28 = sshll.u32 %s1040_s27, 4  ;;  %s21_s26 = int_to_ptr.vmem [resolvable:$true] %s20_s26  ;;  %s43_s28 = int_to_ptr.vmem [resolvable:$true] %s42_s28 }
  0x11   :  { %s956_s29 = scalar_lea.vmem %s21_s26, 128  ;;  %p961_p6 = scmp.lt.s32.totalorder %s21_s26, %s21_s26 }
  0x12   :  { %p957_p5 = scmp.ne.s32.totalorder %s21_s26, %s956_s29  ;;  %p962_p7 = scmp.lt.s32.totalorder %s956_s29, %s956_s29 }
  0x14   :  { %p963_p8 = por %p962_p7, %p961_p6 }
  0x16   :  { %p964_p9 = pnand %p963_p8, %p957_p5 }
  0x18   :  { %967 = shalt.err (!%p964_p9)
}
  0x19   :  { %23 = dma.hbm_to_vmem [thread:$0]  %s1094_s0, 128, %s21_s26, [#allocation3]  }
  0x1a   :  { %s976_s7 = scalar_lea.vmem %s43_s28, 64  ;;  %p981_p11 = scmp.lt.s32.totalorder %s43_s28, %s43_s28 }
  0x1b   :  { %p977_p10 = scmp.ne.s32.totalorder %s43_s28, %s976_s7  ;;  %p982_p12 = scmp.lt.s32.totalorder %s976_s7, %s976_s7 }
  0x1d   :  { %p983_p13 = por %p982_p12, %p981_p11 }
  0x1f   :  { %p984_p0 = pnand %p983_p13, %p977_p10 }
  0x21   :  { %987 = shalt.err (!%p984_p0)
}
  0x22   :  { %45 = dma.hbm_to_vmem [thread:$0]  %s1096_s2, 64, %s43_s28, [#allocation6]  }
  0x23   :  { %s1041_s9 = smov [#allocation8]  }
  0x24   :  { %s51_s10 = sshll.u32 %s1041_s9, 4  ;;  %s52_s10 = int_to_ptr.vmem [resolvable:$true] %s51_s10 }
  0x25   :  { %s996_s11 = scalar_lea.vmem %s52_s10, 8192  ;;  %p1001_p2 = scmp.lt.s32.totalorder %s52_s10, %s52_s10 }
  0x26   :  { %p997_p1 = scmp.ne.s32.totalorder %s52_s10, %s996_s11  ;;  %p1002_p3 = scmp.lt.s32.totalorder %s996_s11, %s996_s11 }
  0x28   :  { %p1003_p4 = por %p1002_p3, %p1001_p2 }
  0x2a   :  { %p1004_p5 = pnand %p1003_p4, %p997_p1 }
  0x2c   :  { %1007 = shalt.err (!%p1004_p5)
}
  0x2d   :  { %s1042_s0 = smov 128   ;;  %s1043_s12 = smov 8  }
  0x2e   :  { %57 = dma.hbm_to_vmem [thread:$0]  %s1097_s3, 8192, %s52_s10, [#allocation9], %s1042_s0, %s1042_s0, %s1043_s12  }
  0x2f   :  { %1028 = dma.done.wait [#allocation3], 128  }
  0x30   :  { %1029 = vsyncadd [#allocation3], 4294967168 }
  0x31   :  { %1030 = dma.done.wait [#allocation6], 1088  }
  0x32   :  { %1031 = vsyncadd [#allocation6], 4294966208 }
  0x33   :  { %1032 = dma.done.wait [#allocation9], 8192  }
  0x34   :  { %1033 = vsyncadd [#allocation9], 4294959104  ;;  %v1044_v0 = vmov 0   ;;  %v820_v1 = vld [vmem:[#allocation5 + $0x24] ss:$16 sps:$4 sm:$0xff]   ;;  %v73_v9 = vld [vmem:[#allocation2] sm:$0xff] }
  0x35   :  { %181 = vmatprep.mubr.bf16.mxu0 %v1044_v0  ;;  %222 = vmatprep.mubr.bf16.mxu1 %v1044_v0  ;;  %v822_v2 = vld [vmem:[#allocation5 + $0x2c] ss:$16 sps:$4 sm:$0xff]   ;;  %v824_v3 = vld [vmem:[#allocation5 + $0x20] ss:$16 sps:$4 sm:$0xff]   ;;  %v825_v4 = vld [vmem:[#allocation5 + $0x28] ss:$16 sps:$4 sm:$0xff]   ;;  %v74_v12 = vpack.c.bf16 %v73_v9, %v73_v9 }
  0x36   :  { %161 = vmatprep.subr.bf16.mxu0 %v820_v1  ;;  %202 = vmatprep.subr.bf16.mxu1 %v822_v2  ;;  %v826_v5 = vld [vmem:[#allocation5 + $0x4] ss:$16 sps:$4 sm:$0xff]   ;;  %v828_v6 = vld [vmem:[#allocation5 + $0xc] ss:$16 sps:$4 sm:$0xff]   ;;  %v830_v7 = vld [vmem:[#allocation5] ss:$16 sps:$4 sm:$0xff]  }
  0x37   :  { %162 = vmatpush1.bf16.msra.mxu0 %v824_v3  ;;  %203 = vmatpush1.bf16.msra.mxu1 %v825_v4  ;;  %v831_v8 = vld [vmem:[#allocation5 + $0x8] ss:$16 sps:$4 sm:$0xff]   ;;  %v832_v10 = vld [vmem:[#allocation8 + $0x70] ss:$8 sps:$4 sm:$0xff]   ;;  %vm145_vm0 = vcmask 261120   ;;  %s1045_s15 = smov [#allocation10]  }
  0x38   :  { %163 = vmatprep.subr.bf16.mxu0 %v826_v5  ;;  %204 = vmatprep.subr.bf16.mxu1 %v828_v6  ;;  %v834_v11 = vld [vmem:[#allocation8 + $0x74] ss:$8 sps:$4 sm:$0xff]   ;;  %v835_v13 = vld [vmem:[#allocation8 + $0x170] ss:$8 sps:$4 sm:$0xff]   ;;  %v840_v15 = vld [vmem:[#allocation8 + $0x64] ss:$8 sps:$4 sm:$0xff]  }
  0x39   :  { %v837_v14 = vld [vmem:[#allocation8 + $0x174] ss:$8 sps:$4 sm:$0xff]   ;;  %v843_v16 = vld [vmem:[#allocation8 + $0x164] ss:$8 sps:$4 sm:$0xff]   ;;  %v838_v17 = vld [vmem:[#allocation8 + $0x60] ss:$8 sps:$4 sm:$0xff]  }
  0x3a   :  { %v841_v18 = vld [vmem:[#allocation8 + $0x160] ss:$8 sps:$4 sm:$0xff]   ;;  %v846_v19 = vld [vmem:[#allocation8 + $0x54] ss:$8 sps:$4 sm:$0xff]   ;;  %v844_v21 = vld [vmem:[#allocation8 + $0x50] ss:$8 sps:$4 sm:$0xff]  }
  0x3b   :  { %164 = vmatpush1.bf16.msra.mxu0 %v830_v7  ;;  %205 = vmatpush1.bf16.msra.mxu1 %v831_v8  ;;  %v849_v20 = vld [vmem:[#allocation8 + $0x154] ss:$8 sps:$4 sm:$0xff]   ;;  %v847_v22 = vld [vmem:[#allocation8 + $0x150] ss:$8 sps:$4 sm:$0xff]   ;;  %v852_v23 = vld [vmem:[#allocation8 + $0x44] ss:$8 sps:$4 sm:$0xff]  }
  0x3c   :  { %635 = vmatprep.subr.bf16.mxu0 %v834_v11  ;;  %676 = vmatprep.subr.bf16.mxu1 %v837_v14  ;;  %v855_v24 = vld [vmem:[#allocation8 + $0x144] ss:$8 sps:$4 sm:$0xff]   ;;  %v850_v25 = vld [vmem:[#allocation8 + $0x40] ss:$8 sps:$4 sm:$0xff]   ;;  %v858_v27 = vld [vmem:[#allocation8 + $0x34] ss:$8 sps:$4 sm:$0xff]   ;;  %v85_v11 = vlaneseq }
  0x3d   :  { %v853_v26 = vld [vmem:[#allocation8 + $0x140] ss:$8 sps:$4 sm:$0xff]   ;;  %v861_v28 = vld [vmem:[#allocation8 + $0x134] ss:$8 sps:$4 sm:$0xff]   ;;  %v856_v29 = vld [vmem:[#allocation8 + $0x30] ss:$8 sps:$4 sm:$0xff]  }
  0x3e   :  { %744 = vmatmul.mubr.msk.bf16.vlgmr.msra.gmra.mxu0 %vm145_vm0, %v74_v12  ;;  %745 = vmatmul.mubr.msk.bf16.vlgmr.msra.gmra.mxu1 %vm145_vm0, %v74_v12  ;;  %v859_v30 = vld [vmem:[#allocation8 + $0x130] ss:$8 sps:$4 sm:$0xff]   ;;  %v864_v31 = vld [vmem:[#allocation8 + $0x24] ss:$8 sps:$4 sm:$0xff]   ;;  %v862_v33 = vld [vmem:[#allocation8 + $0x20] ss:$8 sps:$4 sm:$0xff]  }
  0x3f   :  { %636 = vmatpush1.bf16.msra.mxu0 %v832_v10  ;;  %677 = vmatpush1.bf16.msra.mxu1 %v835_v13  ;;  %v867_v32 = vld [vmem:[#allocation8 + $0x124] ss:$8 sps:$4 sm:$0xff]   ;;  %v865_v34 = vld [vmem:[#allocation8 + $0x120] ss:$8 sps:$4 sm:$0xff]   ;;  %v870_v35 = vld [vmem:[#allocation8 + $0x14] ss:$8 sps:$4 sm:$0xff]  }
  0x40   :  { %637 = vmatprep.subr.bf16.mxu0 %v840_v15  ;;  %678 = vmatprep.subr.bf16.mxu1 %v843_v16  ;;  %v873_v36 = vld [vmem:[#allocation8 + $0x114] ss:$8 sps:$4 sm:$0xff]   ;;  %v868_v37 = vld [vmem:[#allocation8 + $0x10] ss:$8 sps:$4 sm:$0xff]   ;;  %v876_v39 = vld [vmem:[#allocation8 + $0x4] ss:$8 sps:$4 sm:$0xff]  }
  0x41   :  { %v871_v38 = vld [vmem:[#allocation8 + $0x110] ss:$8 sps:$4 sm:$0xff]   ;;  %v879_v40 = vld [vmem:[#allocation8 + $0x104] ss:$8 sps:$4 sm:$0xff]   ;;  %v874_v41 = vld [vmem:[#allocation8] ss:$8 sps:$4 sm:$0xff]  }
  0x42   :  { %v877_v42 = vld [vmem:[#allocation8 + $0x100] ss:$8 sps:$4 sm:$0xff]   ;;  %v882_v43 = vld [vmem:[#allocation8 + $0xf4] ss:$8 sps:$4 sm:$0xff]   ;;  %v880_v45 = vld [vmem:[#allocation8 + $0xf0] ss:$8 sps:$4 sm:$0xff]  }
  0x43   :  { %638 = vmatpush1.bf16.msra.mxu0 %v838_v17  ;;  %679 = vmatpush1.bf16.msra.mxu1 %v841_v18  ;;  %v885_v44 = vld [vmem:[#allocation8 + $0x1f4] ss:$8 sps:$4 sm:$0xff]   ;;  %v883_v46 = vld [vmem:[#allocation8 + $0x1f0] ss:$8 sps:$4 sm:$0xff]   ;;  %v888_v47 = vld [vmem:[#allocation8 + $0xe4] ss:$8 sps:$4 sm:$0xff]  }
  0x44   :  { %639 = vmatprep.subr.bf16.mxu0 %v846_v19  ;;  %680 = vmatprep.subr.bf16.mxu1 %v849_v20  ;;  %v891_v48 = vld [vmem:[#allocation8 + $0x1e4] ss:$8 sps:$4 sm:$0xff]   ;;  %v886_v49 = vld [vmem:[#allocation8 + $0xe0] ss:$8 sps:$4 sm:$0xff]   ;;  %v894_v51 = vld [vmem:[#allocation8 + $0xd4] ss:$8 sps:$4 sm:$0xff]  }
  0x45   :  { %v889_v50 = vld [vmem:[#allocation8 + $0x1e0] ss:$8 sps:$4 sm:$0xff]   ;;  %v897_v52 = vld [vmem:[#allocation8 + $0x1d4] ss:$8 sps:$4 sm:$0xff]   ;;  %v892_v53 = vld [vmem:[#allocation8 + $0xd0] ss:$8 sps:$4 sm:$0xff]  }
  0x46   :  { %v895_v54 = vld [vmem:[#allocation8 + $0x1d0] ss:$8 sps:$4 sm:$0xff]   ;;  %v900_v55 = vld [vmem:[#allocation8 + $0xc4] ss:$8 sps:$4 sm:$0xff]   ;;  %v898_v57 = vld [vmem:[#allocation8 + $0xc0] ss:$8 sps:$4 sm:$0xff]  }
  0x47   :  { %640 = vmatpush1.bf16.msra.mxu0 %v844_v21  ;;  %681 = vmatpush1.bf16.msra.mxu1 %v847_v22  ;;  %v903_v56 = vld [vmem:[#allocation8 + $0x1c4] ss:$8 sps:$4 sm:$0xff]   ;;  %v901_v58 = vld [vmem:[#allocation8 + $0x1c0] ss:$8 sps:$4 sm:$0xff]   ;;  %v906_v59 = vld [vmem:[#allocation8 + $0xb4] ss:$8 sps:$4 sm:$0xff]  }
  0x48   :  { %641 = vmatprep.subr.bf16.mxu0 %v852_v23  ;;  %682 = vmatprep.subr.bf16.mxu1 %v855_v24  ;;  %v909_v60 = vld [vmem:[#allocation8 + $0x1b4] ss:$8 sps:$4 sm:$0xff]   ;;  %v904_v61 = vld [vmem:[#allocation8 + $0xb0] ss:$8 sps:$4 sm:$0xff]   ;;  %v912_v63 = vld [vmem:[#allocation8 + $0xa4] ss:$8 sps:$4 sm:$0xff]  }
  0x49   :  { %v907_v62 = vld [vmem:[#allocation8 + $0x1b0] ss:$8 sps:$4 sm:$0xff]   ;;  %v915_v0 = vld [vmem:[#allocation8 + $0x1a4] ss:$8 sps:$4 sm:$0xff]   ;;  %v910_v1 = vld [vmem:[#allocation8 + $0xa0] ss:$8 sps:$4 sm:$0xff]  }
  0x4a   :  { %v913_v2 = vld [vmem:[#allocation8 + $0x1a0] ss:$8 sps:$4 sm:$0xff]   ;;  %v918_v3 = vld [vmem:[#allocation8 + $0x94] ss:$8 sps:$4 sm:$0xff]   ;;  %v916_v5 = vld [vmem:[#allocation8 + $0x90] ss:$8 sps:$4 sm:$0xff]  }
  0x4b   :  { %642 = vmatpush1.bf16.msra.mxu0 %v850_v25  ;;  %683 = vmatpush1.bf16.msra.mxu1 %v853_v26  ;;  %v921_v4 = vld [vmem:[#allocation8 + $0x194] ss:$8 sps:$4 sm:$0xff]   ;;  %v919_v6 = vld [vmem:[#allocation8 + $0x190] ss:$8 sps:$4 sm:$0xff]   ;;  %v924_v7 = vld [vmem:[#allocation8 + $0x84] ss:$8 sps:$4 sm:$0xff]  }
  0x4c   :  { %643 = vmatprep.subr.bf16.mxu0 %v858_v27  ;;  %684 = vmatprep.subr.bf16.mxu1 %v861_v28  ;;  %v927_v8 = vld [vmem:[#allocation8 + $0x184] ss:$8 sps:$4 sm:$0xff]   ;;  %v922_v9 = vld [vmem:[#allocation8 + $0x80] ss:$8 sps:$4 sm:$0xff]   ;;  %v86_v12 = vshrl.u32 %v85_v11, 7  ;;  %s725_s16 = sshll.u32 %s1045_s15, 4  ;;  %s726_s16 = int_to_ptr.vmem [resolvable:$true] %s725_s16 }
  0x4d   :  { %v925_v10 = vld [vmem:[#allocation8 + $0x180] ss:$8 sps:$4 sm:$0xff]   ;;  %v83_v15 = vld [vmem:[#allocation7] sm:$0xf]  ;;  %p1013_p7 = scmp.lt.s32.totalorder %s726_s16, %s726_s16 }
  0x4e   :  { %v87_v13 = vsub.s32 0, %v86_v12  ;;  %v95_v14 = vsub.s32 2, %v86_v12  ;;  %v91_v16 = vsub.s32 1, %v86_v12  ;;  %v99_v17 = vsub.s32 3, %v86_v12 }
  0x4f   :  { %644 = vmatpush1.bf16.msra.mxu0 %v856_v29  ;;  %685 = vmatpush1.bf16.msra.mxu1 %v859_v30 }
  0x50   :  { %645 = vmatprep.subr.bf16.mxu0 %v864_v31  ;;  %686 = vmatprep.subr.bf16.mxu1 %v867_v32  ;;  %v88_v18 = vrot.slane %v83_v15, %v87_v13  ;;  %v96_v19 = vrot.slane %v83_v15, %v95_v14  ;;  %v92_v20 = vrot.slane %v83_v15, %v91_v16 }
  0x51   :  { %v100_v21 = vrot.slane %v83_v15, %v99_v17 }
  0x53   :  { %646 = vmatpush1.bf16.msra.mxu0 %v862_v33  ;;  %687 = vmatpush1.bf16.msra.mxu1 %v865_v34 }
  0x54   :  { %647 = vmatprep.subr.bf16.mxu0 %v870_v35  ;;  %688 = vmatprep.subr.bf16.mxu1 %v873_v36 }
  0x57   :  { %648 = vmatpush1.bf16.msra.mxu0 %v868_v37  ;;  %689 = vmatpush1.bf16.msra.mxu1 %v871_v38 }
  0x58   :  { %649 = vmatprep.subr.bf16.mxu0 %v876_v39  ;;  %690 = vmatprep.subr.bf16.mxu1 %v879_v40 }
  0x5b   :  { %650 = vmatpush1.bf16.msra.mxu0 %v874_v41  ;;  %691 = vmatpush1.bf16.msra.mxu1 %v877_v42  ;;  %v303_v42 = vld [vmem:[%s1098_s4] sm:$0x3]  ;;  %s1008_s4 = scalar_lea.vmem %s726_s16, 256 }
  0x5c   :  { %651 = vmatprep.subr.bf16.mxu0 %v882_v43  ;;  %692 = vmatprep.subr.bf16.mxu1 %v885_v44  ;;  %v308_v43 = vrot.slane %v303_v42, %v87_v13  ;;  %v312_v44 = vrot.slane %v303_v42, %v91_v16  ;;  %p1009_p6 = scmp.ne.s32.totalorder %s726_s16, %s1008_s4  ;;  %p1014_p8 = scmp.lt.s32.totalorder %s1008_s4, %s1008_s4 }
  0x5e   :  { %p1015_p9 = por %p1014_p8, %p1013_p7 }
  0x5f   :  { %652 = vmatpush2.bf16.msra.mxu0 %v880_v45  ;;  %693 = vmatpush2.bf16.msra.mxu1 %v883_v46 }
  0x60   :  { %653 = vmatprep.subr.bf16.mxu0 %v888_v47  ;;  %694 = vmatprep.subr.bf16.mxu1 %v891_v48  ;;  %p1016_p10 = pnand %p1015_p9, %p1009_p6 }
  0x63   :  { %654 = vmatpush2.bf16.msra.mxu0 %v886_v49  ;;  %695 = vmatpush2.bf16.msra.mxu1 %v889_v50 }
  0x64   :  { %655 = vmatprep.subr.bf16.mxu0 %v894_v51  ;;  %696 = vmatprep.subr.bf16.mxu1 %v897_v52 }
  0x67   :  { %656 = vmatpush2.bf16.msra.mxu0 %v892_v53  ;;  %697 = vmatpush2.bf16.msra.mxu1 %v895_v54 }
  0x68   :  { %657 = vmatprep.subr.bf16.mxu0 %v900_v55  ;;  %698 = vmatprep.subr.bf16.mxu1 %v903_v56 }
  0x6b   :  { %658 = vmatpush2.bf16.msra.mxu0 %v898_v57  ;;  %699 = vmatpush2.bf16.msra.mxu1 %v901_v58 }
  0x6c   :  { %659 = vmatprep.subr.bf16.mxu0 %v906_v59  ;;  %700 = vmatprep.subr.bf16.mxu1 %v909_v60 }
  0x6f   :  { %660 = vmatpush2.bf16.msra.mxu0 %v904_v61  ;;  %701 = vmatpush2.bf16.msra.mxu1 %v907_v62 }
  0x70   :  { %661 = vmatprep.subr.bf16.mxu0 %v912_v63  ;;  %702 = vmatprep.subr.bf16.mxu1 %v915_v0 }
  0x73   :  { %662 = vmatpush2.bf16.msra.mxu0 %v910_v1  ;;  %703 = vmatpush2.bf16.msra.mxu1 %v913_v2 }
  0x74   :  { %663 = vmatprep.subr.bf16.mxu0 %v918_v3  ;;  %704 = vmatprep.subr.bf16.mxu1 %v921_v4 }
  0x77   :  { %664 = vmatpush2.bf16.msra.mxu0 %v916_v5  ;;  %705 = vmatpush2.bf16.msra.mxu1 %v919_v6 }
  0x78   :  { %665 = vmatprep.subr.bf16.mxu0 %v924_v7  ;;  %706 = vmatprep.subr.bf16.mxu1 %v927_v8 }
  0x7b   :  { %666 = vmatpush2.bf16.msra.mxu0 %v922_v9  ;;  %707 = vmatpush2.bf16.msra.mxu1 %v925_v10 }
  0xfe   :  { %v183_v22 = vpop.f32.mrf.mxu0  ;;  %v224_v23 = vpop.f32.mrf.mxu1 }
  0xff   :  { %v184_v24 = vadd.f32 %v183_v22, %v88_v18  ;;  %v225_v25 = vadd.f32 %v224_v23, %v96_v19 }
 0x100   :  { %v185_v26 = vpop.f32.mrf.mxu0  ;;  %v226_v27 = vpop.f32.mrf.mxu1 }
 0x101   :  { %v233_v28 = vmax.f32 %v225_v25, 0.0  ;;  %v186_v29 = vadd.f32 %v185_v26, %v92_v20  ;;  %v227_v30 = vadd.f32 %v226_v27, %v100_v21  ;;  %v231_v31 = vmax.f32 %v184_v24, 0.0 }
 0x102   :  { %v187_v32 = vpop.f32.mrf.mxu0  ;;  %v228_v33 = vpop.f32.mrf.mxu1 }
 0x103   :  { %v232_v34 = vmax.f32 %v186_v29, 0.0  ;;  %v234_v35 = vmax.f32 %v227_v30, 0.0  ;;  %v237_v36 = vpack.c.bf16 %v233_v28, %v233_v28  ;;  %v235_v41 = vpack.c.bf16 %v231_v31, %v231_v31 }
 0x104   :  { %v188_v37 = vpop.f32.mrf.mxu0  ;;  %v229_v38 = vpop.f32.mrf.mxu1 }
 0x105   :  { %v236_v39 = vpack.c.bf16 %v232_v34, %v232_v34  ;;  %v238_v40 = vpack.c.bf16 %v234_v35, %v234_v35 }
 0x107   :  { %667 = vmatprep.mubr.bf16.mxu0 %v236_v39  ;;  %708 = vmatprep.mubr.bf16.mxu1 %v238_v40 }
 0x108   :  { %668 = vmatmul.mubr.bf16.vlgmr.msra.gmra.mxu0 %v235_v41  ;;  %709 = vmatmul.mubr.bf16.vlgmr.msra.gmra.mxu1 %v237_v36 }
 0x1c8   :  { %v669_v45 = vpop.f32.mrf.mxu0  ;;  %v710_v46 = vpop.f32.mrf.mxu1 }
 0x1c9   :  { %v670_v47 = vadd.f32 %v669_v45, %v308_v43 }
 0x1ca   :  { %v671_v48 = vpop.f32.mrf.mxu0  ;;  %v712_v49 = vpop.f32.mrf.mxu1 }
 0x1cb   :  { %v711_v50 = vadd.f32 %v710_v46, %v670_v47  ;;  %v672_v51 = vadd.f32 %v671_v48, %v312_v44 }
 0x1cc   :  { %v673_v52 = vpop.f32.mrf.mxu0  ;;  %v714_v53 = vpop.f32.mrf.mxu1 }
 0x1cd   :  { %717 = vst [vmem:[#allocation10] sm:$0xff] %v711_v50  ;;  %v713_v54 = vadd.f32 %v712_v49, %v672_v51 }
 0x1ce   :  { %v674_v55 = vpop.f32.mrf.mxu0  ;;  %v715_v56 = vpop.f32.mrf.mxu1 }
 0x1cf   :  { %718 = vst [vmem:[#allocation10 + $0x8] sm:$0xff] %v713_v54 }
 0x1d0   :  { %1019 = shalt.err (!%p1016_p10)
}
 0x1d1   :  { %728 = dma.vmem_to_hbm [thread:$0]  %s726_s16, 256, %s1099_s5, [#allocation4]  }
 0x1d2   :  { %1034 = dma.done.wait [#allocation4], 256  }
 0x1d3   :  { %1035 = vsyncadd [#allocation4], 4294967040 }
 0x1d4   :  { %732 = vsyncpa [#allocation3], 1 }
 0x1d5   :  { %733 = vsyncpa [#allocation6], 1 }
 0x1d6   :  { %734 = vsyncpa [#allocation9], 1 }
 0x1d7   :  { %735 = vsyncpa [#allocation4], 1 }

</bundles_post_ra>
